<compile_context>
chip_gen: v5e
topology: v5e:2x2
jax: 0.10.0
libtpu: 0.0.40
codegen_flags: <defaults>
</compile_context>

<pallas_src>
from collections import namedtuple

import numpy as np
import jax
import jax.numpy as jnp
from jax.experimental import pallas as pl
from jax.experimental.pallas import tpu as pltpu

LayerInfo = namedtuple("LayerInfo", ["num_samples", "input_dim", "output_dim"])


def _round_up(x, m):
    return ((x + m - 1) // m) * m


# ----------------------------- Pallas kernel -------------------------------

def _aggregator_kernel(node_ref, nbr_ref, valid_ref, w_ref, out_ref):
    # node_ref : (tile_n, d_in_p)     bf16
    # nbr_ref  : (s, tile_n, d_in_p)  bf16   (dense (tile_n, d) vreg slices)
    # valid_ref: (tile_n, 1)          f32
    # w_ref    : (d_in_p, d_out_p)    bf16
    # out_ref  : (tile_n, d_out_p)    bf16
    s = nbr_ref.shape[0]
    # bf16 accumulation: packed VPU adds on v6e/v7x; the sum feeds a bf16 MXU
    # input anyway, so no extra precision is lost vs. casting afterwards.
    acc = node_ref[...]
    for j in range(s):                                   # short static unroll
        acc = acc + nbr_ref[j]
    out = jnp.dot(acc, w_ref[...], preferred_element_type=jnp.float32)  # MXU
    # Row scaling commutes with the matmul: scale the (tile_n, d_out) result.
    scale = pl.reciprocal(valid_ref[...] + 1.0, approx=True)            # EUP
    out_ref[...] = jnp.maximum(out * scale, 0.0).astype(out_ref.dtype)


# --------------------------- tiling / VMEM policy --------------------------

def _tpu_vmem_capacity_bytes():
    try:
        return int(pltpu.get_tpu_info().vmem_capacity_bytes)
    except Exception:
        return 64 * 2**20          # conservative fallback (v7x per-TC VMEM)


def _choose_tile_n(n, s, d_in_p, d_out_p, *, max_tile_n=1024,
                   target_grid_steps=4):
    """Pick the row-tile size and a consistent scoped-VMEM limit."""
    cap_bytes = _tpu_vmem_capacity_bytes()
    # Scoped limit: half of physical VMEM, capped at 64 MiB
    # (v5e/v6e: 64 of 128 MiB; v7x: 32 of 64 MiB == its scoped default).
    vmem_limit = min(cap_bytes // 2, 64 * 2**20)
    budget = int(vmem_limit * 0.8)          # headroom for compiler scratch
    # Per-row VMEM: double-buffered bf16 streams + in-kernel intermediates.
    per_row = (2 * 2 * d_in_p               # node   (2 bufs, bf16)
               + 2 * 2 * s * d_in_p         # nbr    (2 bufs, bf16)
               + 2 * 2 * d_out_p            # out    (2 bufs, bf16)
               + 2 * 4 * 128                # valid  (2 bufs, f32, lane-pad)
               + 2 * d_in_p                 # bf16 neighbor-sum intermediate
               + 4 * d_out_p)               # f32 matmul result
    # Weight block: charged double-buffered (kept at default buffering).
    fixed = 2 * 2 * d_in_p * d_out_p
    cap_rows = max(16, ((budget - fixed) // per_row) // 16 * 16)
    tile = min(max_tile_n, cap_rows, _round_up(max(n, 1), 16))
    # Keep >= target_grid_steps grid iterations (splittable across v7x's two
    # TensorCores); on v5e/v6e extra steps cost ~0.35us each and tiles >= 128
    # already sit near the HBM roofline, so this is essentially free there.
    split = max(128, _round_up(pl.cdiv(n, target_grid_steps), 16))
    tile = max(16, min(tile, split))
    return int(tile), int(vmem_limit)


# ----------------------------- pallas_call wrapper --------------------------

def _aggregate_call(node, nbr_t, valid, w, tile_n, vmem_limit):
    """relu(((sum_s nbr_t) + node) @ W / (valid+1)) on pre-padded blocks.

    node : (n_p, d_in_p) bf16        nbr_t : (s, n_p, d_in_p) bf16
    valid: (n_p, 1) f32              w     : (d_in_p, d_out_p) bf16
    """
    n_p, d_in_p = node.shape
    s = nbr_t.shape[0]
    d_out_p = w.shape[1]
    grid_spec = pltpu.PrefetchScalarGridSpec(
        num_scalar_prefetch=0,
        grid=(n_p // tile_n,),
        in_specs=[
            pl.BlockSpec((tile_n, d_in_p), lambda i: (i, 0)),
            pl.BlockSpec((s, tile_n, d_in_p), lambda i: (0, i, 0)),
            pl.BlockSpec((tile_n, 1), lambda i: (i, 0)),
            pl.BlockSpec((d_in_p, d_out_p), lambda i: (0, 0)),
        ],
        out_specs=pl.BlockSpec((tile_n, d_out_p), lambda i: (i, 0)),
    )
    return pl.pallas_call(
        _aggregator_kernel,
        out_shape=jax.ShapeDtypeStruct((n_p, d_out_p), jnp.bfloat16),
        grid_spec=grid_spec,
        compiler_params=pltpu.CompilerParams(
            dimension_semantics=("parallel",),
            vmem_limit_bytes=vmem_limit),
    )(node, nbr_t, valid, w)


def _pad_weight(w, d_in_p, d_out_p):
    w = jnp.asarray(w).astype(jnp.bfloat16)
    return jnp.pad(w, ((0, d_in_p - w.shape[0]), (0, d_out_p - w.shape[1])))


def _gathered_aggregate(feat_pad, zero_row, node_idx, nbr_idx, valid, w_p):
    """Layer-0 aggregation: gather straight from feat_pad into kernel layout.

    node_idx : (rows,) int32     nbr_idx : (rows, s) int32   valid : (rows, 1)
    Padded slots are handled at the index level (zero_row / valid 0), so no
    jnp.pad / transpose / concatenate ever touches the (rows, s, d) tensor.
    """
    rows, s = nbr_idx.shape
    d_in_p = feat_pad.shape[1]
    d_out_p = w_p.shape[1]
    tile_n, vmem_limit = _choose_tile_n(rows, s, d_in_p, d_out_p)
    n_p = _round_up(rows, tile_n)
    pad = n_p - rows
    node_idx = np.pad(node_idx, (0, pad), constant_values=zero_row)
    nbr_idx = np.pad(nbr_idx, ((0, pad), (0, 0)), constant_values=zero_row)
    valid = np.pad(np.asarray(valid, np.float32), ((0, pad), (0, 0)))
    node_g = feat_pad[jnp.asarray(node_idx)]          # (n_p, d_in_p)   bf16
    nbr_g = feat_pad[jnp.asarray(nbr_idx.T.copy())]   # (s, n_p, d_in_p) bf16
    out = _aggregate_call(node_g, nbr_g, jnp.asarray(valid), w_p,
                          tile_n, vmem_limit)
    return out[:rows]


def _dense_aggregate(node, nbr_t, valid, w_p):
    """Layer >= 1 aggregation on already-computed (device) hidden states."""
    rows, d_in_p = node.shape
    s = nbr_t.shape[0]
    d_out_p = w_p.shape[1]
    tile_n, vmem_limit = _choose_tile_n(rows, s, d_in_p, d_out_p)
    n_p = _round_up(rows, tile_n)
    pad = n_p - rows
    if pad:
        node = jnp.pad(node, ((0, pad), (0, 0)))
        nbr_t = jnp.pad(nbr_t, ((0, 0), (0, pad), (0, 0)))
    valid_p = jnp.asarray(np.pad(np.asarray(valid, np.float32),
                                 ((0, pad), (0, 0))))
    out = _aggregate_call(node, nbr_t, valid_p, w_p, tile_n, vmem_limit)
    return out[:rows]


# --------------------------- host-side sampling ----------------------------
# Faithful port of GraphSAGE.sample (data-dependent neighbor sampling; host
# side / NumPy in the original code too).

def sample(nodes, adj_lists, layer_infos, rng):
    support_size = [len(nodes)]
    samples = [np.asarray(nodes, dtype=np.int64)]
    num_valid_sample = []
    adj_lists[-1] = list()
    for k in range(len(layer_infos)):
        num_samples = layer_infos[k].num_samples
        neighbors_sample = []
        valid_sample = []
        support_size.append(support_size[k] * num_samples)
        for node in samples[k]:
            node = int(node)
            if len(adj_lists[node]) < num_samples:
                sample_result = list(adj_lists[node]) + [node]
                valid_sample.append([len(sample_result)])
                node_nbr_sample = sample_result + [
                    -1 for _ in range(num_samples - len(adj_lists[node]) - 1)]
            else:
                sample_result = rng.choice(
                    adj_lists[node], num_samples, replace=False)
                valid_sample.append([len(sample_result)])
                node_nbr_sample = list(sample_result)
            neighbors_sample.extend(node_nbr_sample)
        num_valid_sample.append(np.asarray(valid_sample, dtype=np.float32))
        samples.append(np.asarray(neighbors_sample, dtype=np.int64))
    samples.reverse()
    num_valid_sample.reverse()
    support_size.reverse()
    return samples, support_size, num_valid_sample


# ----------------------------- forward pass --------------------------------

def graphsage_forward(features, adj_lists, nodes, mask, layer_infos, weights,
                      rng):
    samples, support_size, num_valid_sample = sample(
        nodes, adj_lists, layer_infos, rng)

    n_feat_rows, feat_dim = features.shape
    d0_p = _round_up(feat_dim, 128)

    # masked_fill(mask, -1), then bf16 + lane padding to a 128 multiple, plus
    # one extra all-zero row used by the -1 padding indices.
    masked = jnp.where(mask, jnp.float32(-1.0), features.astype(jnp.float32))
    feat_pad = jnp.zeros((n_feat_rows + 1, d0_p), jnp.bfloat16)
    feat_pad = feat_pad.at[:n_feat_rows, :feat_dim].set(
        masked.astype(jnp.bfloat16))
    zero_row = n_feat_rows

    idx = [np.where(np.asarray(s_) < 0, zero_row,
                    np.asarray(s_)).astype(np.int32) for s_ in samples]

    # ---------------- layer 0: gather-from-features aggregation ------------
    d_out_p = _round_up(layer_infos[0].output_dim, 128)
    w_p = _pad_weight(weights[0], d0_p, d_out_p)

    pieces = []                                   # (node_idx, nbr_idx, valid, rows, s)
    for k in range(len(idx) - 1):
        rows_k = support_size[k + 1]
        s_k = idx[k].shape[0] // rows_k
        pieces.append((idx[k + 1], idx[k].reshape(rows_k, s_k),
                       np.asarray(num_valid_sample[k], np.float32),
                       rows_k, s_k))

    same_s = all(p[4] == pieces[0][4] for p in pieces)
    if same_s and len(pieces) > 1:
        # Fuse all k-iterations of the layer into ONE pallas_call by
        # concatenating at the *index* level (no device-side concat).
        node_idx = np.concatenate([p[0] for p in pieces])
        nbr_idx = np.concatenate([p[1] for p in pieces], axis=0)
        valid = np.concatenate([p[2] for p in pieces], axis=0)
        out_cat = _gathered_aggregate(feat_pad, zero_row, node_idx, nbr_idx,
                                      valid, w_p)
        hidden, off = [], 0
        for p in pieces:
            hidden.append(out_cat[off:off + p[3]])
            off += p[3]
    else:
        hidden = [_gathered_aggregate(feat_pad, zero_row, p[0], p[1], p[2],
                                      w_p) for p in pieces]

    # ---------------- layers >= 1: aggregate previous hidden states --------
    for iter_idx in range(1, len(weights)):
        d_in_p = hidden[0].shape[1]
        d_out_p = _round_up(layer_infos[iter_idx].output_dim, 128)
        w_p = _pad_weight(weights[iter_idx], d_in_p, d_out_p)
        next_hidden = []
        for k in range(len(hidden) - 1):
            node = hidden[k + 1]
            rows = support_size[iter_idx + k + 1]
            s_k = hidden[k].shape[0] // rows
            # (rows*s_k, d) -> (s_k, rows, d).  This tensor is s_k x smaller
            # than layer-0's neighbor tensor, so this single pass is cheap.
            nbr_t = jnp.transpose(
                jnp.reshape(hidden[k], (rows, s_k, d_in_p)), (1, 0, 2))
            valid = np.asarray(num_valid_sample[iter_idx + k], np.float32)
            next_hidden.append(_dense_aggregate(node, nbr_t, valid, w_p))
        hidden = next_hidden

    # Columns beyond the logical output dim are zero padding; slice them off.
    return hidden[0][:, :layer_infos[-1].output_dim].astype(jnp.float32)


# --------------------------------- main -------------------------------------

if __name__ == "__main__":
    N_NODES = 20
    FEAT = 32
    HIDDEN = 32
    EMBED = 16
    NS0, NS1 = 4, 4

    layer_infos = [
        LayerInfo(num_samples=NS0, input_dim=FEAT, output_dim=HIDDEN),
        LayerInfo(num_samples=NS1, input_dim=HIDDEN, output_dim=EMBED),
    ]

    # Deterministic synthetic graph: first 5 nodes have only 2 neighbors
    # (exercises the padding branch), the rest have 6.
    adj_lists = {}
    for i in range(N_NODES):
        if i < 5:
            adj_lists[i] = [(i + 1) % N_NODES, (i + 3) % N_NODES]
        else:
            adj_lists[i] = [(i + d) % N_NODES for d in (1, 2, 3, 5, 7, 11)]

    nodes = list(range(8))  # 8 query nodes

    key = jax.random.PRNGKey(0)
    k_feat, k_mask, k_w1, k_w2 = jax.random.split(key, 4)

    features = jax.random.normal(k_feat, (N_NODES, FEAT), dtype=jnp.float32)
    mask = jax.random.bernoulli(k_mask, 0.2, (N_NODES, FEAT))

    w1 = jax.random.normal(k_w1, (FEAT, HIDDEN), dtype=jnp.float32) * 0.1
    w2 = jax.random.normal(k_w2, (HIDDEN, EMBED), dtype=jnp.float32) * 0.1
    weights = [w1, w2]

    rng = np.random.RandomState(0)  # deterministic neighbor sampling

    out = graphsage_forward(features, adj_lists, nodes, mask, layer_infos,
                            weights, rng)
    out = jax.block_until_ready(out)
    assert out.shape == (len(nodes), EMBED), out.shape
    assert bool(jnp.all(jnp.isfinite(out)))
    print("KERNEL_OK")
</pallas_src>

<mosaic_0001>
module attributes {stable_mosaic.version = 11 : i64} {
  func.func @_aggregator_kernel(%arg0: i32, %arg1: memref<48x128xbf16, #tpu.memory_space<vmem>>, %arg2: memref<4x48x128xbf16, #tpu.memory_space<vmem>>, %arg3: memref<48x1xf32, #tpu.memory_space<vmem>>, %arg4: memref<128x128xbf16, #tpu.memory_space<vmem>>, %arg5: memref<48x128xbf16, #tpu.memory_space<vmem>>) attributes {dimension_semantics = [#tpu.dimension_semantics<parallel>], iteration_bounds = array<i64: 1>, scalar_prefetch = 0 : i64, scratch_operands = 0 : i64, tpu.core_type = #tpu.core_type<tc>, window_params = [{transform_indices = @transform_0, window_bounds = array<i64: 48, 128>}, {transform_indices = @transform_1, window_bounds = array<i64: 4, 48, 128>}, {transform_indices = @transform_2, window_bounds = array<i64: 48, 1>}, {pipeline_mode = #tpu.pipeline_mode<synchronous>, transform_indices = @transform_3, window_bounds = array<i64: 128, 128>}, {transform_indices = @transform_4, window_bounds = array<i64: 48, 128>}]} {
    %c0 = arith.constant 0 : index
    %c0_0 = arith.constant 0 : index
    %0 = vector.load %arg1[%c0, %c0_0] : memref<48x128xbf16, #tpu.memory_space<vmem>>, vector<48x128xbf16>
    %c0_1 = arith.constant 0 : index
    %c0_2 = arith.constant 0 : index
    %c0_3 = arith.constant 0 : index
    %1 = vector.load %arg2[%c0_1, %c0_2, %c0_3] : memref<4x48x128xbf16, #tpu.memory_space<vmem>>, vector<1x48x128xbf16>
    %2 = vector.shape_cast %1 : vector<1x48x128xbf16> to vector<48x128xbf16>
    %3 = arith.addf %0, %2 : vector<48x128xbf16>
    %c1 = arith.constant 1 : index
    %c0_4 = arith.constant 0 : index
    %c0_5 = arith.constant 0 : index
    %4 = vector.load %arg2[%c1, %c0_4, %c0_5] : memref<4x48x128xbf16, #tpu.memory_space<vmem>>, vector<1x48x128xbf16>
    %5 = vector.shape_cast %4 : vector<1x48x128xbf16> to vector<48x128xbf16>
    %6 = arith.addf %3, %5 : vector<48x128xbf16>
    %c2 = arith.constant 2 : index
    %c0_6 = arith.constant 0 : index
    %c0_7 = arith.constant 0 : index
    %7 = vector.load %arg2[%c2, %c0_6, %c0_7] : memref<4x48x128xbf16, #tpu.memory_space<vmem>>, vector<1x48x128xbf16>
    %8 = vector.shape_cast %7 : vector<1x48x128xbf16> to vector<48x128xbf16>
    %9 = arith.addf %6, %8 : vector<48x128xbf16>
    %c3 = arith.constant 3 : index
    %c0_8 = arith.constant 0 : index
    %c0_9 = arith.constant 0 : index
    %10 = vector.load %arg2[%c3, %c0_8, %c0_9] : memref<4x48x128xbf16, #tpu.memory_space<vmem>>, vector<1x48x128xbf16>
    %11 = vector.shape_cast %10 : vector<1x48x128xbf16> to vector<48x128xbf16>
    %12 = arith.addf %9, %11 : vector<48x128xbf16>
    %c0_10 = arith.constant 0 : index
    %c0_11 = arith.constant 0 : index
    %13 = vector.load %arg4[%c0_10, %c0_11] : memref<128x128xbf16, #tpu.memory_space<vmem>>, vector<128x128xbf16>
    %cst = arith.constant dense<0.000000e+00> : vector<48x128xf32>
    %14 = tpu.matmul %12, %13, %cst {dimension_numbers = #tpu.dot_dimension_numbers<[1], [0], [0], [1], [0, 0, 1, 1], [], []>} : vector<48x128xbf16>, vector<128x128xbf16>, vector<48x128xf32> -> vector<48x128xf32>
    %c0_12 = arith.constant 0 : index
    %c0_13 = arith.constant 0 : index
    %15 = vector.load %arg3[%c0_12, %c0_13] : memref<48x1xf32, #tpu.memory_space<vmem>>, vector<48x1xf32>
    %cst_14 = arith.constant 1.000000e+00 : f32
    %16 = vector.broadcast %cst_14 : f32 to vector<48x1xf32>
    %17 = arith.addf %15, %16 : vector<48x1xf32>
    %18 = tpu.reciprocal %17 {approx = true} : vector<48x1xf32> -> vector<48x1xf32>
    %19 = vector.broadcast %18 : vector<48x1xf32> to vector<48x128xf32>
    %20 = arith.mulf %14, %19 : vector<48x128xf32>
    %cst_15 = arith.constant 0.000000e+00 : f32
    %21 = vector.broadcast %cst_15 : f32 to vector<48x128xf32>
    %22 = arith.maximumf %20, %21 : vector<48x128xf32>
    %23 = arith.truncf %22 : vector<48x128xf32> to vector<48x128xbf16>
    %c0_16 = arith.constant 0 : index
    %c0_17 = arith.constant 0 : index
    %24 = vector.load %arg5[%c0_16, %c0_17] : memref<48x128xbf16, #tpu.memory_space<vmem>>, vector<48x128xbf16>
    tpu.vector_store %arg5[%c0_16, %c0_17], %23 {strides = array<i32>} : memref<48x128xbf16, #tpu.memory_space<vmem>>, vector<48x128xbf16>,
    return
  }
  func.func @transform_0(%arg0: i32) -> (i32, i32) {
    %c0_i32 = arith.constant 0 : i32
    %c0_i32_0 = arith.constant 0 : i32
    return %arg0, %c0_i32 : i32, i32
  }
  func.func @transform_1(%arg0: i32) -> (i32, i32, i32) {
    %c0_i32 = arith.constant 0 : i32
    %c0_i32_0 = arith.constant 0 : i32
    %c0_i32_1 = arith.constant 0 : i32
    return %c0_i32, %arg0, %c0_i32_0 : i32, i32, i32
  }
  func.func @transform_2(%arg0: i32) -> (i32, i32) {
    %c0_i32 = arith.constant 0 : i32
    %c0_i32_0 = arith.constant 0 : i32
    return %arg0, %c0_i32 : i32, i32
  }
  func.func @transform_3(%arg0: i32) -> (i32, i32) {
    %c0_i32 = arith.constant 0 : i32
    %c0_i32_0 = arith.constant 0 : i32
    %c0_i32_1 = arith.constant 0 : i32
    return %c0_i32, %c0_i32_0 : i32, i32
  }
  func.func @transform_4(%arg0: i32) -> (i32, i32) {
    %c0_i32 = arith.constant 0 : i32
    %c0_i32_0 = arith.constant 0 : i32
    return %arg0, %c0_i32 : i32, i32
  }
}

</mosaic_0001>

<bundles_post_ra>
// kernel: tpu_custom_call.1
= control target key start
LH: loop header
LB: loop body
LE: loop exit
PB: predicated region body
PF: predicated region fallthrough
CT: control target
= control target key end

     0   :  { %9 = vsyncpa [#allocation3], 0  ;;  %s710_s0 = inlined_call_operand.vmem [shape: bf16[48,128], index: 0, kind: input, shape index: {}]   ;;  %s711_s1 = inlined_call_operand.hbm [shape: bf16[4,48,128], index: 1, kind: input, shape index: {}]   ;;  %s712_s2 = inlined_call_operand.vmem [shape: f32[48,1], index: 2, kind: input, shape index: {}]   ;;  %s713_s3 = inlined_call_operand.hbm [shape: bf16[128,128], index: 3, kind: input, shape index: {}]   ;;  %s714_s4 = inlined_call_operand.hbm [shape: bf16[48,128], index: 4, kind: output, shape index: {}]  }
   0x1   :  { %10 = vsyncpa [#allocation6], 0 }
   0x2   :  { %11 = vsyncpa [#allocation4], 0  ;;  %s18_s17 = sshll.u32 %s711_s1, 4  ;;  %s598_s18 = smov [#allocation2]   ;;  %s19_s17 = int_to_ptr.hbm [resolvable:$true] %s18_s17 }
   0x3   :  { %s20_s19 = sshll.u32 %s598_s18, 4  ;;  %s33_s22 = sshll.u32 %s713_s3, 4  ;;  %s21_s19 = int_to_ptr.vmem [resolvable:$true] %s20_s19  ;;  %s34_s22 = int_to_ptr.hbm [resolvable:$true] %s33_s22 }
   0x4   :  { %s599_s23 = smov 64   ;;  %s600_s24 = smov 4  }
   0x5   :  { %26 = dma.hbm_to_vmem [thread:$0]  %s19_s17, 1536, %s21_s19, [#allocation3], %s599_s23, %s599_s23, %s600_s24  }
   0x6   :  { %s601_s25 = smov [#allocation5]  }
   0x7   :  { %s35_s26 = sshll.u32 %s601_s25, 4  ;;  %s36_s26 = int_to_ptr.vmem [resolvable:$true] %s35_s26 }
   0x8   :  { %41 = dma.hbm_to_vmem [thread:$0]  %s34_s22, 1024, %s36_s26, [#allocation6], %s599_s23, %s599_s23, %s600_s24  }
   0x9   :  { %592 = dma.done.wait [#allocation3], 1536  }
   0xa   :  { %593 = vsyncadd [#allocation3], 4294965760 }
   0xb   :  { %594 = dma.done.wait [#allocation6], 1024  }
   0xc   :  { %595 = vsyncadd [#allocation6], 4294966272  ;;  %v395_v0 = vld [vmem:[#allocation5 + $0x38] sm:$0xff]  ;;  %v394_v1 = vld [vmem:[#allocation5 + $0x30] sm:$0xff]  ;;  %v602_v13 = vmov 0   ;;  %s342_s19 = sshll.u32 %s714_s4, 4  ;;  %s343_s19 = int_to_ptr.hbm [resolvable:$true] %s342_s19 }
   0xd   :  { %240 = vmatpush.bf16.msra.mxu0 %v395_v0  ;;  %483 = vmatpush.bf16.msra.mxu1 %v395_v0  ;;  %v397_v2 = vld [vmem:[%s710_s0] sm:$0xff]   ;;  %v421_v6 = vld [vmem:[#allocation2 + $0x18] sm:$0xff]   ;;  %v644_v7 = vld [vmem:[#allocation2 + $0x30] sm:$0xff]  }
   0xe   :  { %484 = vmatpush.bf16.msra.mxu2 %v395_v0  ;;  %v398_v3 = vunpack.c.l.bf16 %v397_v2  ;;  %v399_v4 = vunpack.c.h.bf16 %v397_v2  ;;  %v409_v5 = vld [vmem:[#allocation2] sm:$0xff]   ;;  %v646_v10 = vld [vmem:[#allocation2 + $0x48] sm:$0xff]   ;;  %506 = vset.pattern.permute.xlu1 %v602_v13  ;;  %v422_v14 = vunpack.c.l.bf16 %v421_v6  ;;  %v423_v15 = vunpack.c.h.bf16 %v421_v6  ;;  %v653_v24 = vld [vmem:[#allocation2 + $0x38] sm:$0xff]  }
   0xf   :  { %v410_v8 = vunpack.c.l.bf16 %v409_v5  ;;  %v411_v9 = vunpack.c.h.bf16 %v409_v5  ;;  %v471_v11 = vld [vmem:[%s710_s0 + $0x8] sm:$0xff]   ;;  %505 = vset.pattern.permute.xlu0 %v602_v13  ;;  %v434_v16 = vunpack.c.l.bf16 %v644_v7  ;;  %v435_v17 = vunpack.c.h.bf16 %v644_v7  ;;  %v475_v18 = vld [vmem:[#allocation2 + $0x20] sm:$0xff]   ;;  %507 = vset.pattern.permute.xlu2 %v602_v13  ;;  %v472_v29 = vld [vmem:[%s710_s0 + $0x10] sm:$0xff]  }
  0x10   :  { %v473_v12 = vld [vmem:[#allocation2 + $0x8] sm:$0xff]   ;;  %v402_v22 = vunpack.c.l.bf16 %v471_v11  ;;  %v403_v23 = vunpack.c.h.bf16 %v471_v11  ;;  %v446_v25 = vunpack.c.l.bf16 %v646_v10  ;;  %v447_v26 = vunpack.c.h.bf16 %v646_v10  ;;  %v474_v34 = vld [vmem:[#allocation2 + $0x10] sm:$0xff]   ;;  %v392_v40 = vld [vmem:[#allocation5 + $0x20] sm:$0xff] }
  0x11   :  { %241 = vmatpush.bf16.msra.mxu0 %v394_v1  ;;  %485 = vmatpush.bf16.msra.mxu1 %v394_v1  ;;  %v393_v19 = vld [vmem:[#allocation5 + $0x28] sm:$0xff]  ;;  %v74_v20 = vadd.f32 %v410_v8, %v398_v3  ;;  %v75_v21 = vadd.f32 %v411_v9, %v399_v4  ;;  %v414_v27 = vunpack.c.l.bf16 %v473_v12  ;;  %v415_v28 = vunpack.c.h.bf16 %v473_v12  ;;  %v662_v39 = vld [vmem:[#allocation2 + $0x50] sm:$0xff]   ;;  %v666_v58 = vld [vmem:[#allocation2 + $0x40] sm:$0xff]  }
  0x12   :  { %486 = vmatpush.bf16.msra.mxu2 %v394_v1  ;;  %v426_v32 = vunpack.c.l.bf16 %v475_v18  ;;  %v427_v33 = vunpack.c.h.bf16 %v475_v18  ;;  %v438_v37 = vunpack.c.l.bf16 %v653_v24  ;;  %v439_v38 = vunpack.c.h.bf16 %v653_v24  ;;  %v476_v49 = vld [vmem:[#allocation2 + $0x28] sm:$0xff]   ;;  %v391_v59 = vld [vmem:[#allocation5 + $0x18] sm:$0xff]  ;;  %v266_v4 = vld [vmem:[%s712_s2 + $0x10] sm:$0xff] }
  0x13   :  { %v80_v30 = vpack.c.bf16 %v74_v20, %v74_v20  ;;  %v81_v31 = vpack.c.bf16 %v75_v21, %v75_v21  ;;  %v76_v35 = vadd.f32 %v414_v27, %v402_v22  ;;  %v77_v36 = vadd.f32 %v415_v28, %v403_v23  ;;  %v264_v5 = vld [vmem:[%s712_s2] sm:$0xff]  ;;  %v267_v18 = vld [vmem:[%s712_s2 + $0x18] sm:$0xff] }
  0x14   :  { %v406_v43 = vunpack.c.l.bf16 %v472_v29  ;;  %v407_v44 = vunpack.c.h.bf16 %v472_v29  ;;  %v418_v47 = vunpack.c.l.bf16 %v474_v34  ;;  %v419_v48 = vunpack.c.h.bf16 %v474_v34  ;;  %v480_v24 = vld [vmem:[#allocation2 + $0x58] sm:$0xff]  }
  0x15   :  { %242 = vmatpush.bf16.msra.mxu0 %v393_v19  ;;  %487 = vmatpush.bf16.msra.mxu1 %v393_v19  ;;  %v93_v41 = vunpack.c.l.bf16 %v80_v30  ;;  %v94_v42 = vunpack.c.l.bf16 %v81_v31  ;;  %v82_v45 = vpack.c.bf16 %v76_v35, %v76_v35  ;;  %v83_v46 = vpack.c.bf16 %v77_v36, %v77_v36  ;;  %v265_v31 = vld [vmem:[%s712_s2 + $0x8] sm:$0xff]  ;;  %v268_v36 = vld [vmem:[%s712_s2 + $0x20] sm:$0xff] }
  0x16   :  { %488 = vmatpush.bf16.msra.mxu2 %v393_v19  ;;  %v450_v52 = vunpack.c.l.bf16 %v662_v39  ;;  %v451_v53 = vunpack.c.h.bf16 %v662_v39  ;;  %v78_v56 = vadd.f32 %v418_v47, %v406_v43  ;;  %v79_v57 = vadd.f32 %v419_v48, %v407_v44  ;;  %v390_v19 = vld [vmem:[#allocation5 + $0x10] sm:$0xff] }
  0x17   :  { %v105_v50 = vadd.f32 %v422_v14, %v93_v41  ;;  %v106_v51 = vadd.f32 %v423_v15, %v94_v42  ;;  %v95_v54 = vunpack.c.l.bf16 %v82_v45  ;;  %v96_v55 = vunpack.c.l.bf16 %v83_v46 }
  0x18   :  { %v430_v62 = vunpack.c.l.bf16 %v476_v49  ;;  %v431_v63 = vunpack.c.h.bf16 %v476_v49  ;;  %v84_v2 = vpack.c.bf16 %v78_v56, %v78_v56  ;;  %v85_v3 = vpack.c.bf16 %v79_v57, %v79_v57  ;;  %v388_v56 = vld [vmem:[#allocation5] sm:$0xff] }
  0x19   :  { %243 = vmatpush.bf16.msra.mxu0 %v392_v40  ;;  %489 = vmatpush.bf16.msra.mxu1 %v392_v40  ;;  %v111_v60 = vpack.c.bf16 %v105_v50, %v105_v50  ;;  %v112_v61 = vpack.c.bf16 %v106_v51, %v106_v51  ;;  %v107_v0 = vadd.f32 %v426_v32, %v95_v54  ;;  %v442_v9 = vunpack.c.l.bf16 %v666_v58 }
  0x1a   :  { %490 = vmatpush.bf16.msra.mxu2 %v392_v40  ;;  %v108_v1 = vadd.f32 %v427_v33, %v96_v55  ;;  %v443_v11 = vunpack.c.h.bf16 %v666_v58  ;;  %v97_v14 = vunpack.c.l.bf16 %v84_v2  ;;  %v98_v15 = vunpack.c.l.bf16 %v85_v3  ;;  %v389_v40 = vld [vmem:[#allocation5 + $0x8] sm:$0xff] }
  0x1b   :  { %v124_v6 = vunpack.c.l.bf16 %v111_v60  ;;  %v125_v8 = vunpack.c.l.bf16 %v112_v61  ;;  %v113_v12 = vpack.c.bf16 %v107_v0, %v107_v0  ;;  %v272_v22 = vadd.f32 1.0, %v266_v4  ;;  %v269_v60 = vld [vmem:[%s712_s2 + $0x28] sm:$0xff]  ;;  %s603_s2 = smov [#allocation7]  }
  0x1c   :  { %v114_v13 = vpack.c.bf16 %v108_v1, %v108_v1  ;;  %v270_v23 = vadd.f32 1.0, %v264_v5  ;;  %v109_v29 = vadd.f32 %v430_v62, %v97_v14  ;;  %v110_v30 = vadd.f32 %v431_v63, %v98_v15  ;;  %s340_s16 = sshll.u32 %s603_s2, 4  ;;  %s341_s16 = int_to_ptr.vmem [resolvable:$true] %s340_s16 }
  0x1d   :  { %244 = vmatpush.bf16.msra.mxu0 %v391_v59  ;;  %491 = vmatpush.bf16.msra.mxu1 %v391_v59  ;;  %v136_v20 = vadd.f32 %v434_v16, %v124_v6  ;;  %v137_v21 = vadd.f32 %v435_v17, %v125_v8  ;;  %v126_v27 = vunpack.c.l.bf16 %v113_v12  ;;  %508 = vrcp.f32 %v272_v22 }
  0x1e   :  { %492 = vmatpush.bf16.msra.mxu2 %v391_v59  ;;  %v127_v28 = vunpack.c.l.bf16 %v114_v13  ;;  %v273_v34 = vadd.f32 1.0, %v267_v18  ;;  %v115_v17 = vpack.c.bf16 %v109_v29, %v109_v29  ;;  %v116_v35 = vpack.c.bf16 %v110_v30, %v110_v30 }
  0x1f   :  { %v142_v32 = vpack.c.bf16 %v136_v20, %v136_v20  ;;  %v143_v33 = vpack.c.bf16 %v137_v21, %v137_v21  ;;  %v138_v16 = vadd.f32 %v438_v37, %v126_v27  ;;  %510 = vrcp.f32 %v270_v23 }
  0x20   :  { %v139_v7 = vadd.f32 %v439_v38, %v127_v28  ;;  %v271_v43 = vadd.f32 1.0, %v265_v31  ;;  %v128_v37 = vunpack.c.l.bf16 %v115_v17  ;;  %v129_v46 = vunpack.c.l.bf16 %v116_v35 }
  0x21   :  { %245 = vmatpush.bf16.msra.mxu0 %v390_v19  ;;  %493 = vmatpush.bf16.msra.mxu1 %v390_v19  ;;  %v155_v41 = vunpack.c.l.bf16 %v142_v32  ;;  %v156_v42 = vunpack.c.l.bf16 %v143_v33  ;;  %v144_v44 = vpack.c.bf16 %v138_v16, %v138_v16  ;;  %512 = vrcp.f32 %v273_v34 }
  0x22   :  { %494 = vmatpush.bf16.msra.mxu2 %v390_v19  ;;  %v145_v45 = vpack.c.bf16 %v139_v7, %v139_v7  ;;  %v274_v48 = vadd.f32 1.0, %v268_v36  ;;  %v140_v51 = vadd.f32 %v442_v9, %v128_v37  ;;  %v141_v54 = vadd.f32 %v443_v11, %v129_v46 }
  0x23   :  { %v167_v38 = vadd.f32 %v446_v25, %v155_v41  ;;  %v168_v47 = vadd.f32 %v447_v26, %v156_v42  ;;  %v157_v49 = vunpack.c.l.bf16 %v144_v44  ;;  %v509_v55 = vpop.eup %508  ;;  %v454_v57 = vunpack.c.l.bf16 %v480_v24 }
  0x24   :  { %v158_v50 = vunpack.c.l.bf16 %v145_v45  ;;  %v455_v58 = vunpack.c.h.bf16 %v480_v24  ;;  %514 = vrcp.f32 %v271_v43  ;;  %v146_v26 = vpack.c.bf16 %v140_v51, %v140_v51  ;;  %294 = vperm.xlu1 %506, %v509_v55  }
  0x25   :  { %246 = vmatpush.bf16.msra.mxu0 %v389_v40  ;;  %495 = vmatpush.bf16.msra.mxu1 %v389_v40  ;;  %v169_v25 = vadd.f32 %v450_v52, %v157_v49  ;;  %v147_v59 = vpack.c.bf16 %v141_v54, %v141_v54  ;;  %v511_v61 = vpop.eup %510  ;;  %516 = vrcp.f32 %v274_v48  ;;  %v173_v62 = vpack.c.bf16 %v168_v47, %v167_v38 }
  0x26   :  { %496 = vmatpush.bf16.msra.mxu2 %v389_v40  ;;  %v170_v10 = vadd.f32 %v451_v53, %v158_v50  ;;  %v159_v0 = vunpack.c.l.bf16 %v146_v26  ;;  %284 = vperm.xlu0 %505, %v511_v61   ;;  %v275_v52 = vadd.f32 1.0, %v269_v60 }
  0x27   :  { %v160_v1 = vunpack.c.l.bf16 %v147_v59  ;;  %v513_v2 = vpop.eup %512 }
  0x28   :  { %v174_v63 = vpack.c.bf16 %v170_v10, %v169_v25  ;;  %v171_v39 = vadd.f32 %v454_v57, %v159_v0  ;;  %518 = vrcp.f32 %v275_v52 }
  0x29   :  { %247 = vmatpush.bf16.msra.mxu0 %v388_v56  ;;  %497 = vmatpush.bf16.msra.mxu1 %v388_v56  ;;  %v172_v53 = vadd.f32 %v455_v58, %v160_v1 }
  0x2a   :  { %498 = vmatpush.bf16.msra.mxu2 %v388_v56  ;;  %v515_v3 = vpop.eup %514 }
  0x2b   :  { %v175_v4 = vpack.c.bf16 %v172_v53, %v171_v39  ;;  %v517_v5 = vpop.eup %516 }
  0x2c   :  { %248 = vmatmul.bf16.vlgmr.msra.gmra.mxu0 %v173_v62  ;;  %253 = vmatmul.bf16.vlgmr.msra.gmra.mxu1 %v174_v63 }
  0x2d   :  { %258 = vmatmul.bf16.vlgmr.msra.gmra.mxu2 %v175_v4  ;;  %304 = vperm.xlu2 %507, %v517_v5  }
  0x2e   :  { %299 = vperm.xlu1 %506, %v513_v2   ;;  %289 = vperm.xlu0 %505, %v515_v3   ;;  %v519_v6 = vpop.eup %518 }
  0x35   :  { %309 = vperm.xlu2 %507, %v519_v6  }
  0x87   :  { %v305_v13 = vpop.permute.xlu2 %304 }
  0x8f   :  { %v310_v16 = vpop.permute.xlu2 %309 }
  0x96   :  { %v295_v9 = vpop.permute.xlu1 %294 }
  0x98   :  { %v285_v8 = vpop.permute.xlu0 %284 }
  0xa0   :  { %v290_v15 = vpop.permute.xlu0 %289  ;;  %v300_v21 = vpop.permute.xlu1 %299 }
  0xa9   :  { %v249_v11 = vpop.f32.mrf.mxu0  ;;  %v254_v12 = vpop.f32.mrf.mxu1 }
  0xaa   :  { %v312_v14 = vmul.f32 %v285_v8, %v249_v11  ;;  %v314_v18 = vmul.f32 %v295_v9, %v254_v12 }
  0xac   :  { %v318_v28 = vmax.f32 %v312_v14, 0.0  ;;  %v320_v30 = vmax.f32 %v314_v18, 0.0 }
  0xb0   :  { %v259_v19 = vpop.f32.mrf.mxu2 }
  0xb1   :  { %v251_v20 = vpop.f32.mrf.mxu0  ;;  %v256_v23 = vpop.f32.mrf.mxu1  ;;  %v316_v34 = vmul.f32 %v305_v13, %v259_v19 }
  0xb2   :  { %v313_v22 = vmul.f32 %v290_v15, %v251_v20  ;;  %v315_v27 = vmul.f32 %v300_v21, %v256_v23 }
  0xb3   :  { %v322_v35 = vmax.f32 %v316_v34, 0.0 }
  0xb4   :  { %v319_v29 = vmax.f32 %v313_v22, 0.0  ;;  %v321_v31 = vmax.f32 %v315_v27, 0.0 }
  0xb6   :  { %v459_v32 = vpack.c.bf16 %v319_v29, %v318_v28  ;;  %v464_v33 = vpack.c.bf16 %v321_v31, %v320_v30 }
  0xb8   :  { %460 = vst [vmem:[#allocation7] sm:$0xff] %v459_v32   ;;  %v261_v7 = vpop.f32.mrf.mxu2 }
  0xb9   :  { %481 = vst [vmem:[#allocation7 + $0x8] sm:$0xff] %v464_v33   ;;  %v317_v17 = vmul.f32 %v310_v16, %v261_v7 }
  0xbb   :  { %v323_v36 = vmax.f32 %v317_v17, 0.0 }
  0xbd   :  { %v469_v40 = vpack.c.bf16 %v323_v36, %v322_v35 }
  0xbf   :  { %482 = vst [vmem:[#allocation7 + $0x10] sm:$0xff] %v469_v40  }
  0xc0   :  { %348 = dma.vmem_to_hbm [thread:$0]  %s341_s16, 384, %s343_s19, [#allocation4], %s599_s23, %s599_s23, %s600_s24  }
  0xc1   :  { %596 = dma.done.wait [#allocation4], 384  }
  0xc2   :  { %597 = vsyncadd [#allocation4], 4294966912 }
  0xc3   :  { %353 = vsyncpa [#allocation3], 1 }
  0xc4   :  { %354 = vsyncpa [#allocation6], 1 }
  0xc5   :  { %355 = vsyncpa [#allocation4], 1 }

</bundles_post_ra>
